<compile_context>
chip_gen: v7x
topology: tpu7x:2x2x1
jax: 0.10.0
libtpu: 0.0.40
codegen_flags: <defaults>
</compile_context>

<pallas_src>
import jax
import jax.numpy as jnp
import numpy as np
from jax import lax
from jax.experimental import pallas as pl

# ----------------------- configuration (small synthetic) -----------------------
B, L, C = 2, 16, 32          # batch, sequence length, hidden_dim
NUM_HEADS = 4
WINDOW_SIZE = 8
WINDOW_SIZE_FACTOR = 1
SHIFT = 1                    # exercise the shifted-window path
USE_GLOBAL_ATTENTION = False
MLP_RATIO = 4.0

HEAD_DIM = C // NUM_HEADS
MLP_HIDDEN = int(C * MLP_RATIO)
SCALE = HEAD_DIM ** (-0.5)
LN_EPS = 1e-5
N_ROWS = B * L
NEG_INF = -1e30
PACK_LANES = 128             # lane width of the packed score tensor / MLP hidden

# this toy config packs exactly into 128 lanes
assert NUM_HEADS * N_ROWS == PACK_LANES
assert MLP_HIDDEN == PACK_LANES
assert L % WINDOW_SIZE == 0

# ----------------------- parameter/constant slab layout (rows of a (.,128) f32 slab) ---
R_SIG = 0                    # (N_ROWS, N_ROWS)  sigma permutation (lanes 0:32)
R_WQ = R_SIG + N_ROWS        # (C, C)            Wq * scale       (lanes 0:32)
R_WK = R_WQ + C              # (C, C)            Wk               (lanes 0:32)
R_WV = R_WK + C              # (C, C)            Wv               (lanes 0:32)
R_RT = R_WV + C              # (N_ROWS, 128)     R_TILE  (eye tiled per head)
R_KB = R_RT + N_ROWS         # (C, 128)          KBLK    (head block mask)
R_MA = R_KB + C              # (N_ROWS, 128)     additive window mask (tiled per head)
R_W1 = R_MA + N_ROWS         # (C, 128)          w_fc1
R_W2T = R_W1 + C             # (C, 128)          w_fc2^T (lane-dense)
R_VEC = R_W2T + C            # 8 rows: g1,b1,g2,b2,bq*scale,bk,bv,b_fc2 (lanes 0:32)
R_BF1 = R_VEC + 8            # 1 row : b_fc1 (128 lanes)
SLAB_ROWS = R_BF1 + 8        # pad to a multiple of 8 -> 304 rows


# ----------------------- static tables (fold roll+partition+reverse+unroll) ----
def build_static_tables():
    n_w = L // WINDOW_SIZE
    shift_amt = (WINDOW_SIZE // WINDOW_SIZE_FACTOR) if (SHIFT and not USE_GLOBAL_ATTENTION) else 0
    N = N_ROWS

    # perm_in[p]: original row feeding partitioned row p (partition flat order is
    # (b, s, w), source shifted row l_sh = w*ws + s, roll(+shift): src = (l_sh-shift)%L).
    perm_in = np.zeros(N, np.int64)
    for p in range(N):
        b, rem = p // L, p % L
        s, w = rem // n_w, rem % n_w
        l_sh = w * WINDOW_SIZE + s
        perm_in[p] = b * L + (l_sh - shift_amt) % L

    # p_out[r]: partitioned row read by final output row r
    # (window_reverse is the flat row identity; roll(-shift): out[l] = rev[(l+shift)%L]).
    p_out = np.zeros(N, np.int64)
    for r in range(N):
        b, l = r // L, r % L
        p_out[r] = b * L + (l + shift_amt) % L

    # sigma = perm_in o p_out : the ONE remaining row gather.  Attention computed
    # on y = P_sigma @ LN(x) with the window mask below lands directly in final
    # output row order (softmax is invariant to key enumeration order).
    sigma = perm_in[p_out]
    p_sig = np.zeros((N, N), np.float32)
    p_sig[np.arange(N), sigma] = 1.0

    # window mask in final-row order: r, r' interact iff p_out(r), p_out(r') share a window.
    win = p_out // WINDOW_SIZE
    mask_win = np.where(win[:, None] == win[None, :], 0.0, NEG_INF).astype(np.float32)
    mask_add = np.tile(mask_win, (1, NUM_HEADS))                    # (N, H*N)

    # R_TILE[j, h*N + j'] = (j == j') : expands k/v rows into each head's lane slab.
    r_tile = np.tile(np.eye(N, dtype=np.float32), (1, NUM_HEADS))   # (N, H*N)

    # KBLK[c, h*N + j] = (c // head_dim == h) : per-head channel block mask.
    ch = np.arange(C)[:, None] // HEAD_DIM
    hm = np.arange(NUM_HEADS * N)[None, :] // N
    kblk = (ch == hm).astype(np.float32)                            # (C, H*N)

    return {"p_sig": p_sig, "mask_add": mask_add, "r_tile": r_tile, "kblk": kblk}


def pack_params(params, tables):
    """Coalesce every parameter / static table into ONE lane-dense f32 slab."""
    slab = np.zeros((SLAB_ROWS, PACK_LANES), np.float32)
    wqkv = np.asarray(params["wqkv"])
    bqkv = np.asarray(params["bqkv"]).reshape(-1)

    slab[R_SIG:R_SIG + N_ROWS, :N_ROWS] = tables["p_sig"]
    slab[R_WQ:R_WQ + C, :C] = wqkv[:, 0:C] * SCALE                  # scale folded at pack time
    slab[R_WK:R_WK + C, :C] = wqkv[:, C:2 * C]
    slab[R_WV:R_WV + C, :C] = wqkv[:, 2 * C:3 * C]
    slab[R_RT:R_RT + N_ROWS, :] = tables["r_tile"]
    slab[R_KB:R_KB + C, :] = tables["kblk"]
    slab[R_MA:R_MA + N_ROWS, :] = tables["mask_add"]
    slab[R_W1:R_W1 + C, :MLP_HIDDEN] = np.asarray(params["w_fc1"])
    slab[R_W2T:R_W2T + C, :MLP_HIDDEN] = np.asarray(params["w_fc2"]).T
    vecs = [np.asarray(params["g1"]).reshape(-1), np.asarray(params["b1"]).reshape(-1),
            np.asarray(params["g2"]).reshape(-1), np.asarray(params["b2"]).reshape(-1),
            bqkv[0:C] * SCALE, bqkv[C:2 * C], bqkv[2 * C:3 * C],
            np.asarray(params["b_fc2"]).reshape(-1)]
    for i, v in enumerate(vecs):
        slab[R_VEC + i, :C] = v
    slab[R_BF1, :MLP_HIDDEN] = np.asarray(params["b_fc1"]).reshape(-1)
    return jnp.asarray(slab)


# ----------------------- exact (erf) GELU from safe primitives -----------------
_A1, _A2, _A3, _A4, _A5 = 0.254829592, -0.284496736, 1.421413741, -1.453152027, 1.061405429
_PP = 0.3275911
_INV_SQRT2 = 0.7071067811865476


def _erf_poly(z):
    # Abramowitz & Stegun 7.1.26, |abs error| <= 1.5e-7; exp/mul/add/where only.
    sgn = jnp.where(z >= 0.0, 1.0, -1.0)
    az = jnp.abs(z)
    t = 1.0 / (1.0 + _PP * az)
    poly = ((((_A5 * t + _A4) * t + _A3) * t + _A2) * t + _A1) * t
    return sgn * (1.0 - poly * jnp.exp(-az * az))


def _gelu_exact(h):
    return 0.5 * h * (1.0 + _erf_poly(h * _INV_SQRT2))


# ----------------------- the single fused kernel -------------------------------
def _swin_block_kernel(x_ref, w_ref, o_ref):
    f32 = jnp.float32
    nt = (((1,), (1,)), ((), ()))        # contract dim1 x dim1  (A @ B^T)
    tn = (((0,), (0,)), ((), ()))        # contract dim0 x dim0  (A^T @ B)

    x = x_ref[...]                                               # (N, C) raw input = shortcut

    # ---- unpack the parameter slab (all slices static) ----
    p_sig = w_ref[R_SIG:R_SIG + N_ROWS, 0:N_ROWS]
    w_q = w_ref[R_WQ:R_WQ + C, 0:C]
    w_k = w_ref[R_WK:R_WK + C, 0:C]
    w_v = w_ref[R_WV:R_WV + C, 0:C]
    r_tile = w_ref[R_RT:R_RT + N_ROWS, :]
    kblk = w_ref[R_KB:R_KB + C, :]
    mask_add = w_ref[R_MA:R_MA + N_ROWS, :]
    w1 = w_ref[R_W1:R_W1 + C, :]
    w2t = w_ref[R_W2T:R_W2T + C, :]
    g1 = w_ref[R_VEC + 0:R_VEC + 1, 0:C]
    b1 = w_ref[R_VEC + 1:R_VEC + 2, 0:C]
    g2 = w_ref[R_VEC + 2:R_VEC + 3, 0:C]
    b2 = w_ref[R_VEC + 3:R_VEC + 4, 0:C]
    b_q = w_ref[R_VEC + 4:R_VEC + 5, 0:C]
    b_k = w_ref[R_VEC + 5:R_VEC + 6, 0:C]
    b_v = w_ref[R_VEC + 6:R_VEC + 7, 0:C]
    b_o2 = w_ref[R_VEC + 7:R_VEC + 8, 0:C]
    b_h1 = w_ref[R_BF1:R_BF1 + 1, :]

    # ---- norm1 (LayerNorm over channels) ----
    mu = jnp.mean(x, axis=-1, keepdims=True)
    var = jnp.mean((x - mu) ** 2, axis=-1, keepdims=True)
    xn = (x - mu) * lax.rsqrt(var + LN_EPS) * g1 + b1

    # ---- single fused row gather (roll + partition + reverse + roll-back) ----
    y = jnp.dot(p_sig, xn, preferred_element_type=f32)           # (N, C)

    # ---- q/k/v (q scale folded into w_q / b_q at pack time) ----
    q = jnp.dot(y, w_q, preferred_element_type=f32) + b_q
    k = jnp.dot(y, w_k, preferred_element_type=f32) + b_k
    v = jnp.dot(y, w_v, preferred_element_type=f32) + b_v

    # ---- lane-packed scores for all heads at once: (N, H*N) = (32, 128) ----
    k_rep = lax.dot_general(k, r_tile, tn, preferred_element_type=f32)    # (C, H*N)
    s = jnp.dot(q, k_rep * kblk, preferred_element_type=f32) + mask_add   # (N, H*N)
    s = s - jnp.max(s, axis=-1, keepdims=True)     # full-lane row max (safe: same max in num & den)
    p = jnp.exp(s)                                 # masked lanes -> exp(~-1e30) = 0 exactly

    v_rep = lax.dot_general(v, r_tile, tn, preferred_element_type=f32)    # (C, H*N)
    ctx = lax.dot_general(p, v_rep * kblk, nt, preferred_element_type=f32)  # (N, C), head-major
    den = lax.dot_general(p, kblk, nt, preferred_element_type=f32)          # per-head row sums
    attn = ctx * pl.reciprocal(den, approx=True)
    # NOTE: the reference discards self.proj(x)/self.proj_drop(x) (never assigned
    # back), so no output projection is applied — faithful reproduction.

    x1 = x + attn                                                # first residual

    # ---- norm2 + MLP + second residual ----
    mu2 = jnp.mean(x1, axis=-1, keepdims=True)
    var2 = jnp.mean((x1 - mu2) ** 2, axis=-1, keepdims=True)
    xn2 = (x1 - mu2) * lax.rsqrt(var2 + LN_EPS) * g2 + b2

    h = jnp.dot(xn2, w1, preferred_element_type=f32) + b_h1      # (N, MLP_HIDDEN) lane-dense
    h = _gelu_exact(h)
    y2 = lax.dot_general(h, w2t, nt, preferred_element_type=f32) + b_o2   # (N, C)

    o_ref[...] = x1 + y2


# ----------------------- wrapper: one grid-less pallas_call ---------------------
@jax.jit
def swin_block_forward(x, slab):
    Bx, Lx, Cx = x.shape
    x2d = x.reshape(Bx * Lx, Cx)                                 # free metadata reshape
    bytes_accessed = int(slab.size) * 4 + 2 * int(x2d.size) * 4
    out2d = pl.pallas_call(
        _swin_block_kernel,
        out_shape=jax.ShapeDtypeStruct((Bx * Lx, Cx), x.dtype),
        # no grid: single invocation, everything (~170 KiB) VMEM-resident;
        # default scoped-VMEM limit is plenty, so no vmem_limit override.
        cost_estimate=pl.CostEstimate(flops=2_200_000, transcendentals=8_192,
                                      bytes_accessed=bytes_accessed),
    )(x2d, slab)
    return out2d.reshape(Bx, Lx, Cx)


# ----------------------- pure-JAX reference (mirrors the PyTorch code) ----------
def window_partition(x, window_size):
    Bx, Lx, Cx = x.shape
    x = x.reshape(Bx, Lx // window_size, window_size, Cx)
    x = jnp.transpose(x, (0, 2, 1, 3))
    return x.reshape(-1, window_size, Cx)


def window_reverse(windows, window_size, Lx):
    Bx = windows.shape[0] // (Lx // window_size)
    x = windows.reshape(Bx, Lx // window_size, window_size, -1)
    return x.reshape(Bx, Lx, -1)


def reference_forward(x, p):
    Bx, Lx, Cx = x.shape
    shortcut = x
    mu = jnp.mean(x, -1, keepdims=True)
    var = jnp.mean((x - mu) ** 2, -1, keepdims=True)
    xn = (x - mu) / jnp.sqrt(var + LN_EPS) * p["g1"] + p["b1"]
    if SHIFT and (not USE_GLOBAL_ATTENTION):
        xs = jnp.roll(xn, WINDOW_SIZE // WINDOW_SIZE_FACTOR, axis=1)
        xw = window_partition(xs, WINDOW_SIZE)
    else:
        xw = window_partition(xn, WINDOW_SIZE)
    Bw, ws, _ = xw.shape
    qkv = xw @ p["wqkv"] + p["bqkv"]
    qkv = qkv.reshape(Bw, ws, 3, NUM_HEADS, HEAD_DIM).transpose(2, 0, 3, 1, 4)
    q, k, v = qkv[0] * SCALE, qkv[1], qkv[2]
    att = jax.nn.softmax(q @ jnp.swapaxes(k, -2, -1), axis=-1)
    ow = (att @ v).transpose(0, 2, 1, 3).reshape(Bw, ws, Cx)
    if SHIFT and (not USE_GLOBAL_ATTENTION):
        rev = window_reverse(ow, WINDOW_SIZE, Lx)
        x_att = jnp.roll(rev, (-WINDOW_SIZE) // WINDOW_SIZE_FACTOR, axis=1)
    else:
        x_att = window_reverse(ow, WINDOW_SIZE, Lx)
    x1 = shortcut + x_att
    mu2 = jnp.mean(x1, -1, keepdims=True)
    var2 = jnp.mean((x1 - mu2) ** 2, -1, keepdims=True)
    xn2 = (x1 - mu2) / jnp.sqrt(var2 + LN_EPS) * p["g2"] + p["b2"]
    h = jax.nn.gelu(xn2 @ p["w_fc1"] + p["b_fc1"], approximate=False)
    return x1 + h @ p["w_fc2"] + p["b_fc2"]


# ----------------------- deterministic parameter init --------------------------
def init_params(key):
    ks = jax.random.split(key, 6)
    f32 = jnp.float32
    return {
        "g1": jnp.ones((1, C), f32), "b1": jnp.zeros((1, C), f32),
        "g2": jnp.ones((1, C), f32), "b2": jnp.zeros((1, C), f32),
        "wqkv": 0.05 * jax.random.normal(ks[0], (C, 3 * C), f32),
        "bqkv": 0.05 * jax.random.normal(ks[1], (1, 3 * C), f32),
        "w_fc1": 0.05 * jax.random.normal(ks[2], (C, MLP_HIDDEN), f32),
        "b_fc1": 0.05 * jax.random.normal(ks[3], (1, MLP_HIDDEN), f32),
        "w_fc2": 0.05 * jax.random.normal(ks[4], (MLP_HIDDEN, C), f32),
        "b_fc2": 0.05 * jax.random.normal(ks[5], (1, C), f32),
        # self.proj weights exist in the PyTorch module but its output is
        # discarded in forward(), so they are intentionally not materialized.
    }


if __name__ == "__main__":
    key = jax.random.PRNGKey(0)
    kx, kp = jax.random.split(key)
    x = jax.random.normal(kx, (B, L, C), jnp.float32)
    params = init_params(kp)
    tables = build_static_tables()
    slab = pack_params(params, tables)

    out = swin_block_forward(x, slab)
    out = jax.block_until_ready(out)

    ref = reference_forward(x, params)
    assert out.shape == (B, L, C)
    np.testing.assert_allclose(np.asarray(out), np.asarray(ref), rtol=2e-2, atol=2e-2)

    print("KERNEL_OK")
</pallas_src>

<mosaic_0001>
module attributes {stable_mosaic.version = 11 : i64} {
  func.func @_swin_block_kernel(%arg0: memref<32x32xf32, #tpu.memory_space<vmem>>, %arg1: memref<304x128xf32, #tpu.memory_space<vmem>>, %arg2: memref<32x32xf32, #tpu.memory_space<vmem>>) attributes {dimension_semantics = [], scalar_prefetch = 0 : i64, scratch_operands = 0 : i64, tpu.core_type = #tpu.core_type<tc>} {
    %c0 = arith.constant 0 : index
    %c0_0 = arith.constant 0 : index
    %0 = vector.load %arg0[%c0, %c0_0] : memref<32x32xf32, #tpu.memory_space<vmem>>, vector<32x32xf32>
    %c0_1 = arith.constant 0 : index
    %c0_2 = arith.constant 0 : index
    %1 = vector.load %arg1[%c0_1, %c0_2] : memref<304x128xf32, #tpu.memory_space<vmem>>, vector<32x32xf32>
    %c32 = arith.constant 32 : index
    %c0_3 = arith.constant 0 : index
    %2 = vector.load %arg1[%c32, %c0_3] : memref<304x128xf32, #tpu.memory_space<vmem>>, vector<32x32xf32>
    %c64 = arith.constant 64 : index
    %c0_4 = arith.constant 0 : index
    %3 = vector.load %arg1[%c64, %c0_4] : memref<304x128xf32, #tpu.memory_space<vmem>>, vector<32x32xf32>
    %c96 = arith.constant 96 : index
    %c0_5 = arith.constant 0 : index
    %4 = vector.load %arg1[%c96, %c0_5] : memref<304x128xf32, #tpu.memory_space<vmem>>, vector<32x32xf32>
    %c128 = arith.constant 128 : index
    %c0_6 = arith.constant 0 : index
    %5 = vector.load %arg1[%c128, %c0_6] : memref<304x128xf32, #tpu.memory_space<vmem>>, vector<32x128xf32>
    %c160 = arith.constant 160 : index
    %c0_7 = arith.constant 0 : index
    %6 = vector.load %arg1[%c160, %c0_7] : memref<304x128xf32, #tpu.memory_space<vmem>>, vector<32x128xf32>
    %c192 = arith.constant 192 : index
    %c0_8 = arith.constant 0 : index
    %7 = vector.load %arg1[%c192, %c0_8] : memref<304x128xf32, #tpu.memory_space<vmem>>, vector<32x128xf32>
    %c224 = arith.constant 224 : index
    %c0_9 = arith.constant 0 : index
    %8 = vector.load %arg1[%c224, %c0_9] : memref<304x128xf32, #tpu.memory_space<vmem>>, vector<32x128xf32>
    %c256 = arith.constant 256 : index
    %c0_10 = arith.constant 0 : index
    %9 = vector.load %arg1[%c256, %c0_10] : memref<304x128xf32, #tpu.memory_space<vmem>>, vector<32x128xf32>
    %c288 = arith.constant 288 : index
    %c0_11 = arith.constant 0 : index
    %10 = vector.load %arg1[%c288, %c0_11] : memref<304x128xf32, #tpu.memory_space<vmem>>, vector<1x32xf32>
    %c289 = arith.constant 289 : index
    %c0_12 = arith.constant 0 : index
    %11 = vector.load %arg1[%c289, %c0_12] : memref<304x128xf32, #tpu.memory_space<vmem>>, vector<1x32xf32>
    %c290 = arith.constant 290 : index
    %c0_13 = arith.constant 0 : index
    %12 = vector.load %arg1[%c290, %c0_13] : memref<304x128xf32, #tpu.memory_space<vmem>>, vector<1x32xf32>
    %c291 = arith.constant 291 : index
    %c0_14 = arith.constant 0 : index
    %13 = vector.load %arg1[%c291, %c0_14] : memref<304x128xf32, #tpu.memory_space<vmem>>, vector<1x32xf32>
    %c292 = arith.constant 292 : index
    %c0_15 = arith.constant 0 : index
    %14 = vector.load %arg1[%c292, %c0_15] : memref<304x128xf32, #tpu.memory_space<vmem>>, vector<1x32xf32>
    %c293 = arith.constant 293 : index
    %c0_16 = arith.constant 0 : index
    %15 = vector.load %arg1[%c293, %c0_16] : memref<304x128xf32, #tpu.memory_space<vmem>>, vector<1x32xf32>
    %c294 = arith.constant 294 : index
    %c0_17 = arith.constant 0 : index
    %16 = vector.load %arg1[%c294, %c0_17] : memref<304x128xf32, #tpu.memory_space<vmem>>, vector<1x32xf32>
    %c295 = arith.constant 295 : index
    %c0_18 = arith.constant 0 : index
    %17 = vector.load %arg1[%c295, %c0_18] : memref<304x128xf32, #tpu.memory_space<vmem>>, vector<1x32xf32>
    %c296 = arith.constant 296 : index
    %c0_19 = arith.constant 0 : index
    %18 = vector.load %arg1[%c296, %c0_19] : memref<304x128xf32, #tpu.memory_space<vmem>>, vector<1x128xf32>
    %cst = arith.constant dense<0.000000e+00> : vector<32xf32>
    %19 = vector.multi_reduction <add>, %0, %cst [1] : vector<32x32xf32> to vector<32xf32>
    %20 = vector.shape_cast %19 : vector<32xf32> to vector<32x1xf32>
    %cst_20 = arith.constant 3.200000e+01 : f32
    %21 = vector.broadcast %cst_20 : f32 to vector<32x1xf32>
    %22 = arith.divf %20, %21 : vector<32x1xf32>
    %23 = vector.broadcast %22 : vector<32x1xf32> to vector<32x32xf32>
    %24 = arith.subf %0, %23 : vector<32x32xf32>
    %25 = arith.mulf %24, %24 : vector<32x32xf32>
    %cst_21 = arith.constant dense<0.000000e+00> : vector<32xf32>
    %26 = vector.multi_reduction <add>, %25, %cst_21 [1] : vector<32x32xf32> to vector<32xf32>
    %27 = vector.shape_cast %26 : vector<32xf32> to vector<32x1xf32>
    %cst_22 = arith.constant 3.200000e+01 : f32
    %28 = vector.broadcast %cst_22 : f32 to vector<32x1xf32>
    %29 = arith.divf %27, %28 : vector<32x1xf32>
    %30 = vector.broadcast %22 : vector<32x1xf32> to vector<32x32xf32>
    %31 = arith.subf %0, %30 : vector<32x32xf32>
    %cst_23 = arith.constant 9.99999974E-6 : f32
    %32 = vector.broadcast %cst_23 : f32 to vector<32x1xf32>
    %33 = arith.addf %29, %32 : vector<32x1xf32>
    %34 = math.rsqrt %33 : vector<32x1xf32>
    %35 = vector.broadcast %34 : vector<32x1xf32> to vector<32x32xf32>
    %36 = arith.mulf %31, %35 : vector<32x32xf32>
    %37 = vector.broadcast %10 : vector<1x32xf32> to vector<32x32xf32>
    %38 = arith.mulf %36, %37 : vector<32x32xf32>
    %39 = vector.broadcast %11 : vector<1x32xf32> to vector<32x32xf32>
    %40 = arith.addf %38, %39 : vector<32x32xf32>
    %cst_24 = arith.constant dense<0.000000e+00> : vector<32x32xf32>
    %41 = tpu.matmul %1, %40, %cst_24 {dimension_numbers = #tpu.dot_dimension_numbers<[1], [0], [0], [1], [0, 0, 1, 1], [], []>} : vector<32x32xf32>, vector<32x32xf32>, vector<32x32xf32> -> vector<32x32xf32>
    %cst_25 = arith.constant dense<0.000000e+00> : vector<32x32xf32>
    %42 = tpu.matmul %41, %2, %cst_25 {dimension_numbers = #tpu.dot_dimension_numbers<[1], [0], [0], [1], [0, 0, 1, 1], [], []>} : vector<32x32xf32>, vector<32x32xf32>, vector<32x32xf32> -> vector<32x32xf32>
    %43 = vector.broadcast %14 : vector<1x32xf32> to vector<32x32xf32>
    %44 = arith.addf %42, %43 : vector<32x32xf32>
    %cst_26 = arith.constant dense<0.000000e+00> : vector<32x32xf32>
    %45 = tpu.matmul %41, %3, %cst_26 {dimension_numbers = #tpu.dot_dimension_numbers<[1], [0], [0], [1], [0, 0, 1, 1], [], []>} : vector<32x32xf32>, vector<32x32xf32>, vector<32x32xf32> -> vector<32x32xf32>
    %46 = vector.broadcast %15 : vector<1x32xf32> to vector<32x32xf32>
    %47 = arith.addf %45, %46 : vector<32x32xf32>
    %cst_27 = arith.constant dense<0.000000e+00> : vector<32x32xf32>
    %48 = tpu.matmul %41, %4, %cst_27 {dimension_numbers = #tpu.dot_dimension_numbers<[1], [0], [0], [1], [0, 0, 1, 1], [], []>} : vector<32x32xf32>, vector<32x32xf32>, vector<32x32xf32> -> vector<32x32xf32>
    %49 = vector.broadcast %16 : vector<1x32xf32> to vector<32x32xf32>
    %50 = arith.addf %48, %49 : vector<32x32xf32>
    %cst_28 = arith.constant dense<0.000000e+00> : vector<32x128xf32>
    %51 = tpu.matmul %47, %5, %cst_28 {dimension_numbers = #tpu.dot_dimension_numbers<[0], [0], [1], [1], [0, 1, 1, 1], [], []>} : vector<32x32xf32>, vector<32x128xf32>, vector<32x128xf32> -> vector<32x128xf32>
    %52 = arith.mulf %51, %6 : vector<32x128xf32>
    %cst_29 = arith.constant dense<0.000000e+00> : vector<32x128xf32>
    %53 = tpu.matmul %44, %52, %cst_29 {dimension_numbers = #tpu.dot_dimension_numbers<[1], [0], [0], [1], [0, 0, 1, 1], [], []>} : vector<32x32xf32>, vector<32x128xf32>, vector<32x128xf32> -> vector<32x128xf32>
    %54 = arith.addf %53, %7 : vector<32x128xf32>
    %cst_30 = arith.constant dense<0xFF800000> : vector<32xf32>
    %55 = vector.multi_reduction <maximumf>, %54, %cst_30 [1] : vector<32x128xf32> to vector<32xf32>
    %56 = vector.shape_cast %55 : vector<32xf32> to vector<32x1xf32>
    %57 = vector.broadcast %56 : vector<32x1xf32> to vector<32x128xf32>
    %58 = arith.subf %54, %57 : vector<32x128xf32>
    %59 = math.exp %58 : vector<32x128xf32>
    %cst_31 = arith.constant dense<0.000000e+00> : vector<32x128xf32>
    %60 = tpu.matmul %50, %5, %cst_31 {dimension_numbers = #tpu.dot_dimension_numbers<[0], [0], [1], [1], [0, 1, 1, 1], [], []>} : vector<32x32xf32>, vector<32x128xf32>, vector<32x128xf32> -> vector<32x128xf32>
    %61 = arith.mulf %60, %6 : vector<32x128xf32>
    %cst_32 = arith.constant dense<0.000000e+00> : vector<32x32xf32>
    %62 = tpu.matmul %59, %61, %cst_32 {dimension_numbers = #tpu.dot_dimension_numbers<[1], [1], [0], [0], [0, 0, 1, 0], [], []>} : vector<32x128xf32>, vector<32x128xf32>, vector<32x32xf32> -> vector<32x32xf32>
    %cst_33 = arith.constant dense<0.000000e+00> : vector<32x32xf32>
    %63 = tpu.matmul %59, %6, %cst_33 {dimension_numbers = #tpu.dot_dimension_numbers<[1], [1], [0], [0], [0, 0, 1, 0], [], []>} : vector<32x128xf32>, vector<32x128xf32>, vector<32x32xf32> -> vector<32x32xf32>
    %64 = tpu.reciprocal %63 {approx = true} : vector<32x32xf32> -> vector<32x32xf32>
    %65 = arith.mulf %62, %64 : vector<32x32xf32>
    %66 = arith.addf %0, %65 : vector<32x32xf32>
    %cst_34 = arith.constant dense<0.000000e+00> : vector<32xf32>
    %67 = vector.multi_reduction <add>, %66, %cst_34 [1] : vector<32x32xf32> to vector<32xf32>
    %68 = vector.shape_cast %67 : vector<32xf32> to vector<32x1xf32>
    %cst_35 = arith.constant 3.200000e+01 : f32
    %69 = vector.broadcast %cst_35 : f32 to vector<32x1xf32>
    %70 = arith.divf %68, %69 : vector<32x1xf32>
    %71 = vector.broadcast %70 : vector<32x1xf32> to vector<32x32xf32>
    %72 = arith.subf %66, %71 : vector<32x32xf32>
    %73 = arith.mulf %72, %72 : vector<32x32xf32>
    %cst_36 = arith.constant dense<0.000000e+00> : vector<32xf32>
    %74 = vector.multi_reduction <add>, %73, %cst_36 [1] : vector<32x32xf32> to vector<32xf32>
    %75 = vector.shape_cast %74 : vector<32xf32> to vector<32x1xf32>
    %cst_37 = arith.constant 3.200000e+01 : f32
    %76 = vector.broadcast %cst_37 : f32 to vector<32x1xf32>
    %77 = arith.divf %75, %76 : vector<32x1xf32>
    %78 = vector.broadcast %70 : vector<32x1xf32> to vector<32x32xf32>
    %79 = arith.subf %66, %78 : vector<32x32xf32>
    %cst_38 = arith.constant 9.99999974E-6 : f32
    %80 = vector.broadcast %cst_38 : f32 to vector<32x1xf32>
    %81 = arith.addf %77, %80 : vector<32x1xf32>
    %82 = math.rsqrt %81 : vector<32x1xf32>
    %83 = vector.broadcast %82 : vector<32x1xf32> to vector<32x32xf32>
    %84 = arith.mulf %79, %83 : vector<32x32xf32>
    %85 = vector.broadcast %12 : vector<1x32xf32> to vector<32x32xf32>
    %86 = arith.mulf %84, %85 : vector<32x32xf32>
    %87 = vector.broadcast %13 : vector<1x32xf32> to vector<32x32xf32>
    %88 = arith.addf %86, %87 : vector<32x32xf32>
    %cst_39 = arith.constant dense<0.000000e+00> : vector<32x128xf32>
    %89 = tpu.matmul %88, %8, %cst_39 {dimension_numbers = #tpu.dot_dimension_numbers<[1], [0], [0], [1], [0, 0, 1, 1], [], []>} : vector<32x32xf32>, vector<32x128xf32>, vector<32x128xf32> -> vector<32x128xf32>
    %90 = vector.broadcast %18 : vector<1x128xf32> to vector<32x128xf32>
    %91 = arith.addf %89, %90 : vector<32x128xf32>
    %cst_40 = arith.constant 5.000000e-01 : f32
    %92 = vector.broadcast %cst_40 : f32 to vector<32x128xf32>
    %93 = arith.mulf %92, %91 : vector<32x128xf32>
    %cst_41 = arith.constant 0.707106769 : f32
    %94 = vector.broadcast %cst_41 : f32 to vector<32x128xf32>
    %95 = arith.mulf %91, %94 : vector<32x128xf32>
    %cst_42 = arith.constant 0.000000e+00 : f32
    %96 = vector.broadcast %cst_42 : f32 to vector<32x128xf32>
    %97 = arith.cmpf oge, %95, %96 : vector<32x128xf32>
    %cst_43 = arith.constant 1.000000e+00 : f32
    %cst_44 = arith.constant -1.000000e+00 : f32
    %98 = vector.broadcast %cst_43 : f32 to vector<32x128xf32>
    %99 = vector.broadcast %cst_44 : f32 to vector<32x128xf32>
    %100 = arith.select %97, %98, %99 : vector<32x128xi1>, vector<32x128xf32>
    %101 = math.absf %95 : vector<32x128xf32>
    %cst_45 = arith.constant 0.327591091 : f32
    %102 = vector.broadcast %cst_45 : f32 to vector<32x128xf32>
    %103 = arith.mulf %102, %101 : vector<32x128xf32>
    %cst_46 = arith.constant 1.000000e+00 : f32
    %104 = vector.broadcast %cst_46 : f32 to vector<32x128xf32>
    %105 = arith.addf %104, %103 : vector<32x128xf32>
    %cst_47 = arith.constant 1.000000e+00 : f32
    %106 = vector.broadcast %cst_47 : f32 to vector<32x128xf32>
    %107 = arith.divf %106, %105 : vector<32x128xf32>
    %cst_48 = arith.constant 1.06140542 : f32
    %108 = vector.broadcast %cst_48 : f32 to vector<32x128xf32>
    %109 = arith.mulf %108, %107 : vector<32x128xf32>
    %cst_49 = arith.constant -1.45315206 : f32
    %110 = vector.broadcast %cst_49 : f32 to vector<32x128xf32>
    %111 = arith.addf %109, %110 : vector<32x128xf32>
    %112 = arith.mulf %111, %107 : vector<32x128xf32>
    %cst_50 = arith.constant 1.42141378 : f32
    %113 = vector.broadcast %cst_50 : f32 to vector<32x128xf32>
    %114 = arith.addf %112, %113 : vector<32x128xf32>
    %115 = arith.mulf %114, %107 : vector<32x128xf32>
    %cst_51 = arith.constant -0.284496725 : f32
    %116 = vector.broadcast %cst_51 : f32 to vector<32x128xf32>
    %117 = arith.addf %115, %116 : vector<32x128xf32>
    %118 = arith.mulf %117, %107 : vector<32x128xf32>
    %cst_52 = arith.constant 0.254829586 : f32
    %119 = vector.broadcast %cst_52 : f32 to vector<32x128xf32>
    %120 = arith.addf %118, %119 : vector<32x128xf32>
    %121 = arith.mulf %120, %107 : vector<32x128xf32>
    %cst_53 = arith.constant 0.000000e+00 : f32
    %122 = vector.broadcast %cst_53 : f32 to vector<32x128xf32>
    %123 = arith.subf %122, %101 : vector<32x128xf32>
    %124 = arith.mulf %123, %101 : vector<32x128xf32>
    %125 = math.exp %124 : vector<32x128xf32>
    %126 = arith.mulf %121, %125 : vector<32x128xf32>
    %cst_54 = arith.constant 1.000000e+00 : f32
    %127 = vector.broadcast %cst_54 : f32 to vector<32x128xf32>
    %128 = arith.subf %127, %126 : vector<32x128xf32>
    %129 = arith.mulf %100, %128 : vector<32x128xf32>
    %cst_55 = arith.constant 1.000000e+00 : f32
    %130 = vector.broadcast %cst_55 : f32 to vector<32x128xf32>
    %131 = arith.addf %130, %129 : vector<32x128xf32>
    %132 = arith.mulf %93, %131 : vector<32x128xf32>
    %cst_56 = arith.constant dense<0.000000e+00> : vector<32x32xf32>
    %133 = tpu.matmul %132, %9, %cst_56 {dimension_numbers = #tpu.dot_dimension_numbers<[1], [1], [0], [0], [0, 0, 1, 0], [], []>} : vector<32x128xf32>, vector<32x128xf32>, vector<32x32xf32> -> vector<32x32xf32>
    %134 = vector.broadcast %17 : vector<1x32xf32> to vector<32x32xf32>
    %135 = arith.addf %133, %134 : vector<32x32xf32>
    %136 = arith.addf %66, %135 : vector<32x32xf32>
    %c0_57 = arith.constant 0 : index
    %c0_58 = arith.constant 0 : index
    %137 = vector.load %arg2[%c0_57, %c0_58] : memref<32x32xf32, #tpu.memory_space<vmem>>, vector<32x32xf32>
    tpu.vector_store %arg2[%c0_57, %c0_58], %136 {strides = array<i32>} : memref<32x32xf32, #tpu.memory_space<vmem>>, vector<32x32xf32>,
    return
  }
}

</mosaic_0001>

<bundles_post_ra>
// kernel: swin_block_forward.1
= control target key start
LH: loop header
LB: loop body
LE: loop exit
PB: predicated region body
PF: predicated region fallthrough
CT: control target
= control target key end

     0   :  { %7 = vsyncpa [#allocation3], 0  ;;  %s2186_s0 = inlined_call_operand.hbm [shape: f32[32,32], index: 0, kind: input, shape index: {}]   ;;  %s2187_s1 = inlined_call_operand.hbm [shape: f32[304,128], index: 1, kind: input, shape index: {}]   ;;  %s2188_s2 = inlined_call_operand.hbm [shape: f32[32,32], index: 2, kind: output, shape index: {}]  }
   0x1   :  { %8 = vsyncpa [#allocation6], 0 }
   0x2   :  { %9 = vsyncpa [#allocation4], 0  ;;  %s1990_s9 = smov [#allocation2]   ;;  %s1918_s13 = scalar_lea.hbm %s2186_s0, 512 }
   0x3   :  { %s15_s10 = sshll.u32 %s1990_s9, 4  ;;  %p1919_p0 = scmp.ne.s32.totalorder %s2186_s0, %s1918_s13  ;;  %s16_s10 = int_to_ptr.vmem [resolvable:$true] %s15_s10 }
   0x4   :  { %p1922_p1 = scmp.lt.u32.totalorder %s1918_s13, %s2186_s0 }
   0x6   :  { %p1924_p2 = pnand %p1922_p1, %p1919_p0 }
   0x8   :  { %1927 = shalt.err (!%p1924_p2)
}
   0x9   :  { %s1928_s18 = scalar_lea.vmem %s16_s10, 512  ;;  %p1933_p4 = scmp.lt.s32.totalorder %s16_s10, %s16_s10 }
   0xa   :  { %p1929_p3 = scmp.ne.s32.totalorder %s16_s10, %s1928_s18  ;;  %p1934_p5 = scmp.lt.s32.totalorder %s1928_s18, %s1928_s18 }
   0xc   :  { %p1935_p6 = por %p1934_p5, %p1933_p4 }
   0xe   :  { %p1936_p7 = pnand %p1935_p6, %p1929_p3 }
  0x10   :  { %1939 = shalt.err (!%p1936_p7)
}
  0x11   :  { %s1991_s19 = smov 128   ;;  %s1992_s20 = smov 8  }
  0x12   :  { %21 = dma.hbm_to_vmem [thread:$0]  %s2186_s0, 512, %s16_s10, [#allocation3], %s1991_s19, %s1991_s19, %s1992_s20  }
  0x13   :  { %s1993_s23 = smov [#allocation5]   ;;  %s1940_s27 = scalar_lea.hbm %s2187_s1, 4864 }
  0x14   :  { %s27_s24 = sshll.u32 %s1993_s23, 4  ;;  %p1941_p8 = scmp.ne.s32.totalorder %s2187_s1, %s1940_s27  ;;  %s28_s24 = int_to_ptr.vmem [resolvable:$true] %s27_s24 }
  0x15   :  { %p1944_p9 = scmp.lt.u32.totalorder %s1940_s27, %s2187_s1 }
  0x17   :  { %p1946_p10 = pnand %p1944_p9, %p1941_p8 }
  0x19   :  { %1949 = shalt.err (!%p1946_p10)
}
  0x1a   :  { %s1950_s4 = scalar_lea.vmem %s28_s24, 4864  ;;  %p1955_p12 = scmp.lt.s32.totalorder %s28_s24, %s28_s24 }
  0x1b   :  { %p1951_p11 = scmp.ne.s32.totalorder %s28_s24, %s1950_s4  ;;  %p1956_p13 = scmp.lt.s32.totalorder %s1950_s4, %s1950_s4 }
  0x1d   :  { %p1957_p0 = por %p1956_p13, %p1955_p12 }
  0x1f   :  { %p1958_p1 = pnand %p1957_p0, %p1951_p11 }
  0x21   :  { %1961 = shalt.err (!%p1958_p1)
}
  0x22   :  { %33 = dma.hbm_to_vmem [thread:$0]  %s2187_s1, 4864, %s28_s24, [#allocation6], %s1991_s19, %s1991_s19, %s1992_s20  }
  0x23   :  { %1984 = dma.done.wait [#allocation3], 512  }
  0x24   :  { %1985 = vsyncadd [#allocation3], 4294966784 }
  0x25   :  { %1986 = dma.done.wait [#allocation6], 4864  }
  0x26   :  { %1987 = vsyncadd [#allocation6], 4294962432  ;;  %vm89_vm0 = vcmask 261120   ;;  %v2041_v0 = vld [vmem:[#allocation2] sm:$0xff]  ;;  %v2043_v1 = vld [vmem:[#allocation2 + $0x10] sm:$0xff]  ;;  %s1995_s1 = smov [#allocation7]  }
  0x27   :  { %v2045_v2 = vld [vmem:[#allocation2 + $0x8] sm:$0xff]  ;;  %v90_v3 = vsel %vm89_vm0, %v2041_v0, 0.0  ;;  %v96_v4 = vsel %vm89_vm0, %v2043_v1, 0.0  ;;  %v2051_v5 = vld [vmem:[#allocation2 + $0x18] sm:$0xff]  ;;  %v44_v28 = vld [vmem:[#allocation5] sm:$0xff]  ;;  %s1479_s6 = sshll.u32 %s1995_s1, 4  ;;  %s1480_s6 = int_to_ptr.vmem [resolvable:$true] %s1479_s6 }
  0x28   :  { %91 = vadd.xlane.f32.xlu0 %v90_v3  ;;  %97 = vadd.xlane.f32.xlu1 %v96_v4  ;;  %v93_v6 = vsel %vm89_vm0, %v2045_v2, 0.0  ;;  %v99_v7 = vsel %vm89_vm0, %v2051_v5, 0.0  ;;  %v52_v29 = vld [vmem:[#allocation5 + $0x40] sm:$0xff]  ;;  %v53_v30 = vld [vmem:[#allocation5 + $0x48] sm:$0xff]  ;;  %v54_v32 = vld [vmem:[#allocation5 + $0x50] sm:$0xff]  ;;  %s1962_s7 = scalar_lea.vmem %s1480_s6, 512  ;;  %p1967_p3 = scmp.lt.s32.totalorder %s1480_s6, %s1480_s6 }
  0x29   :  { %1629 = vmatprep.mubr.msk.f32.mxu1 %vm89_vm0, %v44_v28  ;;  %v1791_v31 = vpack.c.bf16 %v53_v30, %v52_v29  ;;  %v55_v33 = vld [vmem:[#allocation5 + $0x58] sm:$0xff]  ;;  %v1492_v49 = vld [vmem:[#allocation5 + $0x120] ss:$0 sm:$0xff]  ;;  %v1493_v54 = vld [vmem:[#allocation5 + $0x121] ss:$0 sm:$0xff]  ;;  %p1963_p2 = scmp.ne.s32.totalorder %s1480_s6, %s1962_s7  ;;  %p1968_p4 = scmp.lt.s32.totalorder %s1962_s7, %s1962_s7 }
  0x2a   :  { %v1795_v34 = vpack.c.bf16 %v55_v33, %v54_v32  ;;  %v48_v3 = vld [vmem:[#allocation5 + $0x20] sm:$0xff]  ;;  %v49_v4 = vld [vmem:[#allocation5 + $0x28] sm:$0xff] }
  0x2b   :  { %1792 = vmatprep.subr.bf16.mxu0 %v1791_v31  ;;  %v1498_v29 = vld [vmem:[#allocation5 + $0x124] ss:$0 sm:$0xff]  ;;  %v1503_v30 = vld [vmem:[#allocation5 + $0x125] ss:$0 sm:$0xff]  ;;  %p1969_p5 = por %p1968_p4, %p1967_p3 }
  0x2c   :  { %94 = vadd.xlane.f32.xlu0 %v93_v6  ;;  %100 = vadd.xlane.f32.xlu1 %v99_v7 }
  0x2d   :  { %1794 = vmatpush3.bf16.msra.mxu0 %v1791_v31  ;;  %p1970_p6 = pnand %p1969_p5, %p1963_p2 }
  0x2e   :  { %1796 = vmatprep.subr.bf16.mxu0 %v1795_v34 }
  0x31   :  { %1798 = vmatpush3.bf16.msra.mxu0 %v1795_v34 }
  0xb5   :  { %v92_v8 = vpop.xlane.xlu0 %91  ;;  %v98_v9 = vpop.xlane.xlu1 %97 }
  0xb6   :  { %v103_v10 = vmul.f32 0.03125, %v92_v8  ;;  %v105_v11 = vmul.f32 0.03125, %v98_v9  ;;  %v1783_v9 = vpack.c.bf16 %v49_v4, %v48_v3 }
  0xb8   :  { %v107_v12 = vsub.f32 %v2041_v0, %v103_v10  ;;  %v109_v13 = vsub.f32 %v2043_v1, %v105_v11  ;;  %v50_v10 = vld [vmem:[#allocation5 + $0x30] sm:$0xff]  ;;  %v51_v11 = vld [vmem:[#allocation5 + $0x38] sm:$0xff] }
  0xb9   :  { %v95_v14 = vpop.xlane.xlu0 %94  ;;  %v101_v15 = vpop.xlane.xlu1 %100 }
  0xba   :  { %v104_v16 = vmul.f32 0.03125, %v95_v14  ;;  %v106_v17 = vmul.f32 0.03125, %v101_v15  ;;  %v111_v18 = vmul.f32 %v107_v12, %v107_v12  ;;  %v113_v19 = vmul.f32 %v109_v13, %v109_v13  ;;  %v47_v15 = vld [vmem:[#allocation5 + $0x18] sm:$0xff] }
  0xbb   :  { %v1787_v14 = vpack.c.bf16 %v51_v11, %v50_v10 }
  0xbc   :  { %v108_v20 = vsub.f32 %v2045_v2, %v104_v16  ;;  %v110_v21 = vsub.f32 %v2051_v5, %v106_v17  ;;  %v115_v22 = vsel %vm89_vm0, %v111_v18, 0.0  ;;  %v121_v23 = vsel %vm89_vm0, %v113_v19, 0.0  ;;  %v56_v16 = vld [vmem:[#allocation5 + $0x60] sm:$0xff]  ;;  %v57_v17 = vld [vmem:[#allocation5 + $0x68] sm:$0xff]  ;;  %v58_v19 = vld [vmem:[#allocation5 + $0x70] sm:$0xff] }
  0xbd   :  { %116 = vadd.xlane.f32.xlu0 %v115_v22  ;;  %v1799_v18 = vpack.c.bf16 %v57_v17, %v56_v16 }
  0xbe   :  { %v112_v24 = vmul.f32 %v108_v20, %v108_v20  ;;  %v114_v25 = vmul.f32 %v110_v21, %v110_v21 }
  0xc0   :  { %v118_v26 = vsel %vm89_vm0, %v112_v24, 0.0  ;;  %v124_v27 = vsel %vm89_vm0, %v114_v25, 0.0 }
  0xc1   :  { %122 = vadd.xlane.f32.xlu0 %v121_v23  ;;  %119 = vadd.xlane.f32.xlu1 %v118_v26  ;;  %v60_v26 = vld [vmem:[#allocation5 + $0x80] sm:$0xff] }
  0xc5   :  { %125 = vadd.xlane.f32.xlu1 %v124_v27  ;;  %v61_v27 = vld [vmem:[#allocation5 + $0x88] sm:$0xff] }
  0xc6   :  { %v1807_v28 = vpack.c.bf16 %v61_v27, %v60_v26  ;;  %v69_v26 = vld [vmem:[#allocation5 + $0xc8] sm:$0xff]  ;;  %v68_v27 = vld [vmem:[#allocation5 + $0xc0] sm:$0xff] }
  0xc8   :  { %1808 = vmatprep.subr.bf16.mxu0 %v1807_v28 }
 0x14a   :  { %v117_v35 = vpop.xlane.xlu0 %116 }
 0x14b   :  { %v127_v36 = vmul.f32 0.03125, %v117_v35 }
 0x14d   :  { %v131_v37 = vadd.f32 1e-05, %v127_v36 }
 0x14e   :  { %v120_v38 = vpop.xlane.xlu1 %119  ;;  %v123_v39 = vpop.xlane.xlu0 %122 }
 0x14f   :  { %1870 = vrsqrt.f32 %v131_v37  ;;  %v128_v40 = vmul.f32 0.03125, %v120_v38  ;;  %v129_v41 = vmul.f32 0.03125, %v123_v39  ;;  %v62_v38 = vld [vmem:[#allocation5 + $0x90] sm:$0xff]  ;;  %v63_v39 = vld [vmem:[#allocation5 + $0x98] sm:$0xff] }
 0x151   :  { %v132_v42 = vadd.f32 1e-05, %v128_v40  ;;  %v133_v43 = vadd.f32 1e-05, %v129_v41 }
 0x152   :  { %v126_v44 = vpop.xlane.xlu1 %125 }
 0x153   :  { %1872 = vrsqrt.f32 %v132_v42  ;;  %v130_v45 = vmul.f32 0.03125, %v126_v44  ;;  %v1811_v42 = vpack.c.bf16 %v63_v39, %v62_v38 }
 0x154   :  { %1874 = vrsqrt.f32 %v133_v43 }
 0x155   :  { %v134_v46 = vadd.f32 1e-05, %v130_v45 }
 0x157   :  { %1876 = vrsqrt.f32 %v134_v46 }
 0x159   :  { %v1871_v47 = vpop.eup %1870 }
 0x15a   :  { %v139_v48 = vmul.f32 %v1871_v47, %v107_v12  ;;  %v45_v12 = vld [vmem:[#allocation5 + $0x8] sm:$0xff] }
 0x15c   :  { %v147_v53 = vmul.f32 %v1492_v49, %v139_v48  ;;  %v1508_v48 = vld [vmem:[#allocation5 + $0x126] ss:$0 sm:$0xff] }
 0x15d   :  { %v1873_v50 = vpop.eup %1872 }
 0x15e   :  { %v1875_v51 = vpop.eup %1874  ;;  %v140_v52 = vmul.f32 %v1873_v50, %v108_v20  ;;  %v155_v58 = vadd.f32 %v1493_v54, %v147_v53  ;;  %v59_v20 = vld [vmem:[#allocation5 + $0x78] sm:$0xff] }
 0x15f   :  { %v141_v55 = vmul.f32 %v1875_v51, %v109_v13  ;;  %v46_v13 = vld [vmem:[#allocation5 + $0x10] sm:$0xff]  ;;  %v1803_v23 = vpack.c.bf16 %v59_v20, %v58_v19 }
 0x160   :  { %v148_v56 = vmul.f32 %v1492_v49, %v140_v52 }
 0x161   :  { %v1877_v57 = vpop.eup %1876  ;;  %v149_v61 = vmul.f32 %v1492_v49, %v141_v55 }
 0x162   :  { %v156_v59 = vadd.f32 %v1493_v54, %v148_v56  ;;  %v142_v60 = vmul.f32 %v1877_v57, %v110_v21 }
 0x163   :  { %v157_v6 = vadd.f32 %v1493_v54, %v149_v61 }
 0x164   :  { %v1775_v62 = vpack.c.bf16 %v156_v59, %v155_v58  ;;  %v150_v63 = vmul.f32 %v1492_v49, %v142_v60 }
 0x166   :  { %1776 = vmatprep.subr.bf16.mxu1 %v1775_v62  ;;  %v158_v7 = vadd.f32 %v1493_v54, %v150_v63 }
 0x167   :  { %1778 = vmatpush3.bf16.msra.mxu1 %v1775_v62 }
 0x168   :  { %v1779_v8 = vpack.c.bf16 %v158_v7, %v157_v6  ;;  %v65_v7 = vld [vmem:[#allocation5 + $0xa8] sm:$0xff] }
 0x16a   :  { %1780 = vmatprep.subr.bf16.mxu1 %v1779_v8 }
 0x16b   :  { %1782 = vmatpush3.bf16.msra.mxu1 %v1779_v8  ;;  %v64_v8 = vld [vmem:[#allocation5 + $0xa0] sm:$0xff] }
 0x16c   :  { %1784 = vmatprep.subr.bf16.mxu1 %v1783_v9  ;;  %v1839_v38 = vpack.c.bf16 %v65_v7, %v64_v8 }
 0x16e   :  { %1630 = vmatmul.mubr.msk.f32.vlgmr.msra.gmra.mrb[0].mxu1 %vm89_vm0, %v45_v12 }
 0x16f   :  { %1632 = vmatprep.mubr.msk.f32.mxu1 %vm89_vm0, %v46_v13  ;;  %1786 = vmatpush3.bf16.msra.mxu1 %v1783_v9 }
 0x170   :  { %1788 = vmatprep.subr.bf16.mxu1 %v1787_v14 }
 0x172   :  { %1633 = vmatmul.mubr.msk.f32.gmra.mrb[2].mxu1 %vm89_vm0, %v47_v15  ;;  %v66_v15 = vld [vmem:[#allocation5 + $0xb0] sm:$0xff] }
 0x173   :  { %1790 = vmatpush3.bf16.msra.mxu1 %v1787_v14  ;;  %v67_v14 = vld [vmem:[#allocation5 + $0xb8] sm:$0xff] }
 0x174   :  { %1800 = vmatprep.subr.bf16.mxu1 %v1799_v18 }
 0x241   :  { %v1631_v21 = vpop.f32.mrb[0].mxu1 }
 0x242   :  { %v237_v22 = vpop.f32.mrb[1].mxu1 }
 0x243   :  { %1643 = vmatprep.mubr.msk.f32.mxu1 %vm89_vm0, %v237_v22  ;;  %1657 = vmatprep.mubr.msk.f32.mxu0 %vm89_vm0, %v237_v22 }
 0x244   :  { %1644 = vmatmul.mubr.msk.f32.vlgmr.msra.gmra.mrb[4].mxu1 %vm89_vm0, %v1631_v21  ;;  %1658 = vmatmul.mubr.msk.f32.vlgmr.msra.gmra.mrb[0].mxu0 %vm89_vm0, %v1631_v21 }
 0x245   :  { %v1634_v24 = vpop.f32.mrb[2].mxu1  ;;  %1802 = vmatpush3.bf16.msra.mxu1 %v1799_v18  ;;  %1810 = vmatpush3.bf16.msra.mxu0 %v1807_v28 }
 0x246   :  { %v247_v25 = vpop.f32.mrb[3].mxu1  ;;  %1804 = vmatprep.subr.bf16.mxu1 %v1803_v23  ;;  %1812 = vmatprep.subr.bf16.mxu0 %v1811_v42 }
 0x247   :  { %1646 = vmatprep.mubr.msk.f32.mxu1 %vm89_vm0, %v247_v25  ;;  %1660 = vmatprep.mubr.msk.f32.mxu0 %vm89_vm0, %v247_v25 }
 0x248   :  { %1647 = vmatmul.mubr.msk.f32.gmra.mrb[6].mxu1 %vm89_vm0, %v1634_v24  ;;  %1661 = vmatmul.mubr.msk.f32.gmra.mrb[2].mxu0 %vm89_vm0, %v1634_v24 }
 0x249   :  { %1806 = vmatpush3.bf16.msra.mxu1 %v1803_v23  ;;  %1671 = vmatprep.mubr.msk.f32.mxu1 %vm89_vm0, %v237_v22 }
 0x24a   :  { %1814 = vmatpush3.bf16.msra.mxu0 %v1811_v42 }
 0x24b   :  { %1824 = vmatprep.subr.bf16.mxu0 %v1807_v28 }
 0x24c   :  { %1672 = vmatmul.mubr.msk.f32.vlgmr.msra.gmra.mrb[8].mxu1 %vm89_vm0, %v1631_v21 }
 0x24d   :  { %1674 = vmatprep.mubr.msk.f32.mxu1 %vm89_vm0, %v247_v25 }
 0x250   :  { %1675 = vmatmul.mubr.msk.f32.gmra.mrb[10].mxu1 %vm89_vm0, %v1634_v24 }
 0x317   :  { %v1645_v31 = vpop.f32.mrb[4].mxu1  ;;  %v1659_v32 = vpop.f32.mrb[0].mxu0 }
 0x318   :  { %v2081_v33 = vadd.f32 %v1645_v31, %v1498_v29  ;;  %v338_v34 = vpop.f32.mrb[5].mxu1  ;;  %v427_v35 = vpop.f32.mrb[1].mxu0  ;;  %v433_v46 = vadd.f32 %v1659_v32, %v1503_v30  ;;  %v71_v32 = vld [vmem:[#allocation5 + $0xd8] sm:$0xff] }
 0x319   :  { %v339_v36 = vadd.f32 %v1498_v29, %v338_v34  ;;  %v428_v37 = vadd.f32 %v1503_v30, %v427_v35 }
 0x31b   :  { %535 = vxpose.xlu0.b32.start [1/4] (short) (narrow) %v428_v37, 32  ;;  %1699 = vmatprep.mubr.msk.f32.mxu1 %vm89_vm0, %v339_v36  ;;  %v1648_v40 = vpop.f32.mrb[6].mxu1  ;;  %v1662_v41 = vpop.f32.mrb[2].mxu0 }
 0x31c   :  { %v2084_v43 = vadd.f32 %v1648_v40, %v1498_v29  ;;  %v348_v44 = vpop.f32.mrb[7].mxu1  ;;  %v437_v45 = vpop.f32.mrb[3].mxu0  ;;  %v443_v55 = vadd.f32 %v1662_v41, %v1503_v30 }
 0x31d   :  { %v349_v47 = vadd.f32 %v1498_v29, %v348_v44  ;;  %v438_v51 = vadd.f32 %v1503_v30, %v437_v45  ;;  %v1843_v44 = vpack.c.bf16 %v67_v14, %v66_v15 }
 0x31f   :  { %536 = vxpose.xlu0.b32.cont [2/4] (short) (narrow) %v433_v46, 32  ;;  %v1673_v49 = vpop.f32.mrb[8].mxu1 }
 0x320   :  { %v516_v50 = vpop.f32.mrb[9].mxu1  ;;  %v522_v56 = vadd.f32 %v1673_v49, %v1508_v48 }
 0x321   :  { %v517_v52 = vadd.f32 %v1508_v48, %v516_v50 }
 0x323   :  { %537 = vxpose.xlu0.b32.cont [3/4] (short) (narrow) %v438_v51, 32  ;;  %v1676_v53 = vpop.f32.mrb[10].mxu1  ;;  %785 = vxpose.xlu1.b32.start [1/4] (short) (narrow) %v517_v52, 32 }
 0x324   :  { %v526_v54 = vpop.f32.mrb[11].mxu1  ;;  %v532_v58 = vadd.f32 %v1676_v53, %v1508_v48 }
 0x325   :  { %v527_v57 = vadd.f32 %v1508_v48, %v526_v54 }
 0x327   :  { %538 = vxpose.xlu0.b32.end [4/4] (short) (narrow) %v443_v55, 32  ;;  %786 = vxpose.xlu1.b32.cont [2/4] (short) (narrow) %v522_v56, 32 }
 0x32b   :  { %787 = vxpose.xlu1.b32.cont [3/4] (short) (narrow) %v527_v57, 32 }
 0x32f   :  { %788 = vxpose.xlu1.b32.end [4/4] (short) (narrow) %v532_v58, 32 }
 0x39b   :  { %v551_v59 = vpop.trf.xlu0 }
 0x39c   :  { %1685 = vmatprep.mubr.msk.f32.mxu0 %vm89_vm0, %v551_v59 }
 0x39f   :  { %v552_v60 = vpop.trf.xlu0 }
 0x3a0   :  { %1686 = vmatmul.mubr.msk.f32.vlgmr.msra.gmra.mrb[4].mxu0 %vm89_vm0, %v552_v60 }
 0x3a1   :  { %1826 = vmatpush3.bf16.msra.mxu0 %v1807_v28 }
 0x3a2   :  { %1828 = vmatprep.subr.bf16.mxu0 %v1811_v42 }
 0x3a3   :  { %v553_v61 = vpop.trf.xlu0  ;;  %v801_v63 = vpop.trf.xlu1 }
 0x3a4   :  { %1688 = vmatprep.mubr.msk.f32.mxu0 %vm89_vm0, %v553_v61 }
 0x3a5   :  { %1830 = vmatpush3.bf16.msra.mxu0 %v1811_v42 }
 0x3a6   :  { %1840 = vmatprep.subr.bf16.mxu0 %v1839_v38 }
 0x3a7   :  { %v554_v62 = vpop.trf.xlu0  ;;  %v802_v3 = vpop.trf.xlu1 }
 0x3a8   :  { %1689 = vmatmul.mubr.msk.f32.gmra.mrb[6].mxu0 %vm89_vm0, %v554_v62 }
 0x3a9   :  { %1713 = vmatprep.mubr.msk.f32.mxu0 %vm89_vm0, %v801_v63 }
 0x3ab   :  { %v803_v4 = vpop.trf.xlu1 }
 0x3ac   :  { %1714 = vmatmul.mubr.msk.f32.vlgmr.msra.gmra.mrb[8].mxu0 %vm89_vm0, %v802_v3 }
 0x3ad   :  { %1716 = vmatprep.mubr.msk.f32.mxu0 %vm89_vm0, %v803_v4 }
 0x3ae   :  { %1842 = vmatpush3.bf16.xpose.msra.mxu0 %v1839_v38 }
 0x3af   :  { %v804_v6 = vpop.trf.xlu1  ;;  %1844 = vmatprep.subr.bf16.mxu0 %v1843_v44 }
 0x3b0   :  { %1717 = vmatmul.mubr.msk.f32.gmra.mrb[10].mxu0 %vm89_vm0, %v804_v6 }
 0x3b6   :  { %1846 = vmatpush3.bf16.xpose.msra.mxu0 %v1843_v44  ;;  %v74_v44 = vld [vmem:[#allocation5 + $0xf0] sm:$0xff] }
 0x473   :  { %v1687_v9 = vpop.f32.mrb[4].mxu0 }
 0x474   :  { %v665_v10 = vmul.f32 %v1687_v9, %v65_v7  ;;  %v645_v11 = vpop.f32.mrb[5].mxu0 }
 0x475   :  { %v664_v12 = vmul.f32 %v645_v11, %v64_v8 }
 0x477   :  { %v1815_v13 = vpack.c.bf16 %v665_v10, %v664_v12 }
 0x479   :  { %1816 = vmatprep.subr.bf16.mxu1 %v1815_v13 }
 0x47a   :  { %1818 = vmatpush3.bf16.msra.mxu1 %v1815_v13 }
 0x47b   :  { %v1690_v16 = vpop.f32.mrb[6].mxu0 }
 0x47c   :  { %v667_v17 = vmul.f32 %v1690_v16, %v67_v14  ;;  %v655_v18 = vpop.f32.mrb[7].mxu0 }
 0x47d   :  { %v666_v19 = vmul.f32 %v655_v18, %v66_v15 }
 0x47f   :  { %v1819_v20 = vpack.c.bf16 %v667_v17, %v666_v19  ;;  %v1715_v21 = vpop.f32.mrb[8].mxu0 }
 0x480   :  { %v915_v22 = vmul.f32 %v1715_v21, %v65_v7  ;;  %v895_v23 = vpop.f32.mrb[9].mxu0 }
 0x481   :  { %1820 = vmatprep.subr.bf16.mxu1 %v1819_v20  ;;  %v914_v24 = vmul.f32 %v895_v23, %v64_v8 }
 0x482   :  { %1822 = vmatpush3.bf16.msra.mxu1 %v1819_v20 }
 0x483   :  { %v1831_v25 = vpack.c.bf16 %v915_v22, %v914_v24  ;;  %v1718_v39 = vpop.f32.mrb[10].mxu0 }
 0x484   :  { %v917_v40 = vmul.f32 %v1718_v39, %v67_v14  ;;  %v905_v41 = vpop.f32.mrb[11].mxu0 }
 0x485   :  { %1700 = vmatmul.mubr.msk.f32.vlgmr.msra.gmra.mrb[12].mxu1 %vm89_vm0, %v2081_v33  ;;  %1832 = vmatprep.subr.bf16.mxu1 %v1831_v25  ;;  %v70_v33 = vld [vmem:[#allocation5 + $0xd0] sm:$0xff]  ;;  %v916_v42 = vmul.f32 %v905_v41, %v66_v15  ;;  %v72_v41 = vld [vmem:[#allocation5 + $0xe0] sm:$0xff] }
 0x486   :  { %1702 = vmatprep.mubr.msk.f32.mxu1 %vm89_vm0, %v349_v47 }
 0x489   :  { %1703 = vmatmul.mubr.msk.f32.gmra.mrb[14].mxu1 %vm89_vm0, %v2084_v43  ;;  %v1835_v43 = vpack.c.bf16 %v917_v40, %v916_v42  ;;  %v73_v42 = vld [vmem:[#allocation5 + $0xe8] sm:$0xff] }
 0x48b   :  { %1834 = vmatpush3.bf16.xpose.msra.mxu1 %v1831_v25 }
 0x48c   :  { %1836 = vmatprep.subr.bf16.mxu1 %v1835_v43 }
 0x493   :  { %1838 = vmatpush3.bf16.xpose.msra.mxu1 %v1835_v43  ;;  %v1847_v43 = vpack.c.bf16 %v73_v42, %v72_v41 }
 0x495   :  { %1848 = vmatprep.subr.bf16.mxu1 %v1847_v43 }
 0x558   :  { %v1701_v28 = vpop.f32.mrb[12].mxu1 }
 0x559   :  { %v752_v29 = vadd.f32 %v1701_v28, %v69_v26  ;;  %v746_v30 = vpop.f32.mrb[13].mxu1 }
 0x55a   :  { %v747_v31 = vadd.f32 %v746_v30, %v68_v27 }
 0x55b   :  { %767 = vmax.xlane.f32.xlu1 %v752_v29 }
 0x55c   :  { %v1704_v34 = vpop.f32.mrb[14].mxu1  ;;  %765 = vmax.xlane.f32.xlu0 %v747_v31 }
 0x55d   :  { %v762_v35 = vadd.f32 %v1704_v34, %v71_v32  ;;  %v756_v36 = vpop.f32.mrb[15].mxu1 }
 0x55e   :  { %v757_v37 = vadd.f32 %v756_v36, %v70_v33 }
 0x55f   :  { %771 = vmax.xlane.f32.xlu1 %v762_v35 }
 0x560   :  { %769 = vmax.xlane.f32.xlu0 %v757_v37 }
 0x5e8   :  { %v768_v45 = vpop.xlane.xlu1 %767 }
 0x5e9   :  { %v774_v46 = vsub.f32 %v752_v29, %v768_v45  ;;  %v766_v47 = vpop.xlane.xlu0 %765  ;;  %v75_v45 = vld [vmem:[#allocation5 + $0xf8] sm:$0xff] }
 0x5ea   :  { %v773_v48 = vsub.f32 %v747_v31, %v766_v47 }
 0x5eb   :  { %v779_v49 = vmul.f32 1.442695, %v774_v46  ;;  %v1851_v46 = vpack.c.bf16 %v75_v45, %v74_v44 }
 0x5ec   :  { %v777_v50 = vmul.f32 1.442695, %v773_v48  ;;  %v772_v51 = vpop.xlane.xlu1 %771 }
 0x5ed   :  { %v776_v52 = vsub.f32 %v762_v35, %v772_v51  ;;  %v770_v53 = vpop.xlane.xlu0 %769 }
 0x5ee   :  { %1878 = vpow2.f32 %v777_v50  ;;  %v775_v54 = vsub.f32 %v757_v37, %v770_v53 }
 0x5ef   :  { %1880 = vpow2.f32 %v779_v49  ;;  %v783_v55 = vmul.f32 1.442695, %v776_v52 }
 0x5f0   :  { %v781_v56 = vmul.f32 1.442695, %v775_v54 }
 0x5f2   :  { %1882 = vpow2.f32 %v781_v56 }
 0x5f3   :  { %1884 = vpow2.f32 %v783_v55 }
 0x5f8   :  { %v1879_v57 = vpop.eup %1878 }
 0x5f9   :  { %v1881_v58 = vpop.eup %1880  ;;  %1727 = vmatprep.mubr.f32.mxu1 %v1879_v57  ;;  %1741 = vmatprep.mubr.f32.mxu0 %v1879_v57 }
 0x5fa   :  { %1728 = vmatmul.mubr.f32.vlgmr.msra.gmra.mrb[16].mxu1 %v1881_v58  ;;  %1742 = vmatmul.mubr.f32.vlgmr.msra.gmra.mrb[12].mxu0 %v1881_v58 }
 0x5fb   :  { %1850 = vmatpush3.bf16.msra.mxu1 %v1847_v43 }
 0x5fc   :  { %v1883_v59 = vpop.eup %1882  ;;  %1852 = vmatprep.subr.bf16.mxu1 %v1851_v46 }
 0x5fd   :  { %v1885_v60 = vpop.eup %1884  ;;  %1730 = vmatprep.mubr.f32.mxu1 %v1883_v59  ;;  %1744 = vmatprep.mubr.f32.mxu0 %v1883_v59 }
 0x5fe   :  { %1731 = vmatmul.mubr.f32.gmra.mrb[18].mxu1 %v1885_v60  ;;  %1745 = vmatmul.mubr.f32.gmra.mrb[14].mxu0 %v1885_v60  ;;  %v1525_v60 = vld [vmem:[#allocation5 + $0x122] ss:$0 sm:$0xff] }
 0x5ff   :  { %1854 = vmatpush3.bf16.msra.mxu1 %v1851_v46 }
 0x6cd   :  { %v1729_v61 = vpop.f32.mrb[16].mxu1  ;;  %v1743_v62 = vpop.f32.mrb[12].mxu0 }
 0x6ce   :  { %1886 = vrcp.f32 %v1743_v62  ;;  %v984_v63 = vpop.f32.mrb[17].mxu1  ;;  %v1069_v3 = vpop.f32.mrb[13].mxu0 }
 0x6cf   :  { %1888 = vrcp.f32 %v1069_v3  ;;  %v1526_v3 = vld [vmem:[#allocation5 + $0x123] ss:$0 sm:$0xff] }
 0x6d1   :  { %v1732_v4 = vpop.f32.mrb[18].mxu1  ;;  %v1746_v6 = vpop.f32.mrb[14].mxu0 }
 0x6d2   :  { %1890 = vrcp.f32 %v1746_v6  ;;  %v994_v7 = vpop.f32.mrb[19].mxu1  ;;  %v1079_v8 = vpop.f32.mrb[15].mxu0 }
 0x6d3   :  { %1892 = vrcp.f32 %v1079_v8 }
 0x6d8   :  { %v1887_v9 = vpop.eup %1886 }
 0x6d9   :  { %v1889_v10 = vpop.eup %1888  ;;  %v1093_v11 = vmul.f32 %v1887_v9, %v1729_v61 }
 0x6da   :  { %v1092_v12 = vmul.f32 %v1889_v10, %v984_v63 }
 0x6db   :  { %v2100_v13 = vadd.f32 %v1093_v11, %v2045_v2 }
 0x6dc   :  { %v1891_v14 = vpop.eup %1890  ;;  %v2103_v15 = vadd.f32 %v1092_v12, %v2041_v0 }
 0x6dd   :  { %v1893_v16 = vpop.eup %1892  ;;  %v1103_v17 = vsel %vm89_vm0, %v2100_v13, 0.0  ;;  %v1095_v18 = vmul.f32 %v1891_v14, %v1732_v4 }
 0x6de   :  { %1104 = vadd.xlane.f32.xlu1 %v1103_v17  ;;  %v1100_v19 = vsel %vm89_vm0, %v2103_v15, 0.0  ;;  %v1094_v20 = vmul.f32 %v1893_v16, %v994_v7 }
 0x6df   :  { %1101 = vadd.xlane.f32.xlu0 %v1100_v19  ;;  %v2110_v21 = vadd.f32 %v1095_v18, %v2051_v5  ;;  %v76_v19 = vld [vmem:[#allocation5 + $0x100] sm:$0xff] }
 0x6e0   :  { %v2113_v2 = vadd.f32 %v1094_v20, %v2043_v1  ;;  %v77_v20 = vld [vmem:[#allocation5 + $0x108] sm:$0xff] }
 0x6e1   :  { %v1109_v0 = vsel %vm89_vm0, %v2110_v21, 0.0 }
 0x6e2   :  { %1110 = vadd.xlane.f32.xlu1 %v1109_v0  ;;  %v1106_v22 = vsel %vm89_vm0, %v2113_v2, 0.0  ;;  %v1855_v0 = vpack.c.bf16 %v77_v20, %v76_v19 }
 0x6e3   :  { %1107 = vadd.xlane.f32.xlu0 %v1106_v22  ;;  %v78_v22 = vld [vmem:[#allocation5 + $0x110] sm:$0xff] }
 0x6e4   :  { %1856 = vmatprep.subr.bf16.mxu0 %v1855_v0 }
 0x6e5   :  { %1858 = vmatpush3.bf16.xpose.msra.mxu0 %v1855_v0 }
 0x76b   :  { %v1105_v23 = vpop.xlane.xlu1 %1104 }
 0x76c   :  { %v1113_v24 = vmul.f32 0.03125, %v1105_v23  ;;  %v1102_v25 = vpop.xlane.xlu0 %1101  ;;  %v79_v23 = vld [vmem:[#allocation5 + $0x118] sm:$0xff] }
 0x76d   :  { %v1112_v26 = vmul.f32 0.03125, %v1102_v25  ;;  %v1527_v25 = vld [vmem:[#allocation5 + $0x128] ss:$0 sm:$0xff] }
 0x76e   :  { %v1117_v27 = vsub.f32 %v2100_v13, %v1113_v24  ;;  %v1859_v24 = vpack.c.bf16 %v79_v23, %v78_v22 }
 0x76f   :  { %v1116_v5 = vsub.f32 %v2103_v15, %v1112_v26  ;;  %v1111_v28 = vpop.xlane.xlu1 %1110 }
 0x770   :  { %v1115_v29 = vmul.f32 0.03125, %v1111_v28  ;;  %v1108_v1 = vpop.xlane.xlu0 %1107  ;;  %v1121_v30 = vmul.f32 %v1117_v27, %v1117_v27  ;;  %1860 = vmatprep.subr.bf16.mxu0 %v1859_v24 }
 0x771   :  { %v1114_v31 = vmul.f32 0.03125, %v1108_v1  ;;  %v1120_v32 = vmul.f32 %v1116_v5, %v1116_v5  ;;  %1862 = vmatpush3.bf16.xpose.msra.mxu0 %v1859_v24 }
 0x772   :  { %v1119_v33 = vsub.f32 %v2110_v21, %v1115_v29  ;;  %v1127_v34 = vsel %vm89_vm0, %v1121_v30, 0.0 }
 0x773   :  { %v1118_v35 = vsub.f32 %v2113_v2, %v1114_v31  ;;  %1128 = vadd.xlane.f32.xlu1 %v1127_v34  ;;  %v1124_v36 = vsel %vm89_vm0, %v1120_v32, 0.0 }
 0x774   :  { %1125 = vadd.xlane.f32.xlu0 %v1124_v36  ;;  %v1123_v37 = vmul.f32 %v1119_v33, %v1119_v33 }
 0x775   :  { %v1122_v38 = vmul.f32 %v1118_v35, %v1118_v35 }
 0x776   :  { %v1133_v39 = vsel %vm89_vm0, %v1123_v37, 0.0 }
 0x777   :  { %1134 = vadd.xlane.f32.xlu1 %v1133_v39  ;;  %v1130_v40 = vsel %vm89_vm0, %v1122_v38, 0.0 }
 0x778   :  { %1131 = vadd.xlane.f32.xlu0 %v1130_v40 }
 0x800   :  { %v1129_v47 = vpop.xlane.xlu1 %1128 }
 0x801   :  { %v1137_v48 = vmul.f32 0.03125, %v1129_v47  ;;  %v1126_v49 = vpop.xlane.xlu0 %1125 }
 0x802   :  { %v1136_v50 = vmul.f32 0.03125, %v1126_v49 }
 0x803   :  { %v1141_v51 = vadd.f32 1e-05, %v1137_v48 }
 0x804   :  { %v1140_v52 = vadd.f32 1e-05, %v1136_v50  ;;  %v1135_v53 = vpop.xlane.xlu1 %1134 }
 0x805   :  { %1894 = vrsqrt.f32 %v1141_v51  ;;  %v1139_v54 = vmul.f32 0.03125, %v1135_v53  ;;  %v1132_v55 = vpop.xlane.xlu0 %1131 }
 0x806   :  { %1896 = vrsqrt.f32 %v1140_v52  ;;  %v1138_v56 = vmul.f32 0.03125, %v1132_v55 }
 0x807   :  { %v1143_v57 = vadd.f32 1e-05, %v1139_v54 }
 0x808   :  { %v1142_v58 = vadd.f32 1e-05, %v1138_v56 }
 0x809   :  { %1898 = vrsqrt.f32 %v1143_v57 }
 0x80a   :  { %1900 = vrsqrt.f32 %v1142_v58 }
 0x80f   :  { %v1895_v59 = vpop.eup %1894 }
 0x810   :  { %v1897_v61 = vpop.eup %1896  ;;  %v1149_v62 = vmul.f32 %v1895_v59, %v1117_v27 }
 0x811   :  { %v1148_v63 = vmul.f32 %v1897_v61, %v1116_v5 }
 0x812   :  { %v1157_v4 = vmul.f32 %v1525_v60, %v1149_v62 }
 0x813   :  { %v1899_v6 = vpop.eup %1898  ;;  %v1156_v7 = vmul.f32 %v1525_v60, %v1148_v63 }
 0x814   :  { %v1901_v8 = vpop.eup %1900  ;;  %v1151_v9 = vmul.f32 %v1899_v6, %v1119_v33  ;;  %v1165_v12 = vadd.f32 %v1526_v3, %v1157_v4 }
 0x815   :  { %v1164_v10 = vadd.f32 %v1526_v3, %v1156_v7  ;;  %v1150_v11 = vmul.f32 %v1901_v8, %v1118_v35 }
 0x816   :  { %v1159_v14 = vmul.f32 %v1525_v60, %v1151_v9 }
 0x817   :  { %1755 = vmatprep.mubr.msk.f32.mxu1 %vm89_vm0, %v1164_v10  ;;  %v1158_v16 = vmul.f32 %v1525_v60, %v1150_v11 }
 0x818   :  { %1756 = vmatmul.mubr.msk.f32.vlgmr.msra.gmra.mrb[20].mxu1 %vm89_vm0, %v1165_v12  ;;  %v1167_v18 = vadd.f32 %v1526_v3, %v1159_v14 }
 0x819   :  { %v1166_v17 = vadd.f32 %v1526_v3, %v1158_v16 }
 0x81b   :  { %1758 = vmatprep.mubr.msk.f32.mxu1 %vm89_vm0, %v1166_v17 }
 0x81c   :  { %1759 = vmatmul.mubr.msk.f32.gmra.mrb[22].mxu1 %vm89_vm0, %v1167_v18 }
 0x8eb   :  { %v1757_v26 = vpop.f32.mrb[20].mxu1 }
 0x8ec   :  { %v2131_v27 = vadd.f32 %v1757_v26, %v1527_v25  ;;  %v1250_v5 = vpop.f32.mrb[21].mxu1 }
 0x8ed   :  { %v2133_v28 = vadd.f32 %v1527_v25, %v1250_v5 }
 0x8ee   :  { %v2136_v29 = vmul.f32 0.70710677, %v2131_v27 }
 0x8ef   :  { %v2139_v1 = vmul.f32 0.70710677, %v2133_v28  ;;  %v1760_v30 = vpop.f32.mrb[22].mxu1 }
 0x8f0   :  { %v1286_v31 = vand.u32 2147483647, %v2136_v29  ;;  %v2142_v32 = vadd.f32 %v1760_v30, %v1527_v25  ;;  %v1260_v33 = vpop.f32.mrb[23].mxu1  ;;  %vm1278_vm1 = vcmp.ge.f32.partialorder %v2136_v29, 0.0 }
 0x8f1   :  { %v1285_v34 = vand.u32 2147483647, %v2139_v1  ;;  %v2145_v35 = vadd.f32 %v1527_v25, %v1260_v33  ;;  %vm1277_vm2 = vcmp.ge.f32.partialorder %v2139_v1, 0.0  ;;  %v1269_v1 = vmul.f32 0.5, %v2133_v28 }
 0x8f2   :  { %v1290_v36 = vmul.f32 0.3275911, %v1286_v31  ;;  %v2148_v38 = vmul.f32 0.70710677, %v2142_v32  ;;  %v1342_v47 = vsub.f32 0.0, %v1286_v31 }
 0x8f3   :  { %v1289_v37 = vmul.f32 0.3275911, %v1285_v34  ;;  %v2151_v40 = vmul.f32 0.70710677, %v2145_v35  ;;  %v1341_v49 = vsub.f32 0.0, %v1285_v34 }
 0x8f4   :  { %v1294_v39 = vadd.f32 1.0, %v1290_v36  ;;  %v1288_v42 = vand.u32 2147483647, %v2148_v38  ;;  %v1346_v51 = vmul.f32 %v1342_v47, %v1286_v31  ;;  %vm1280_vm3 = vcmp.ge.f32.partialorder %v2148_v38, 0.0 }
 0x8f5   :  { %v1293_v41 = vadd.f32 1.0, %v1289_v37  ;;  %v1287_v44 = vand.u32 2147483647, %v2151_v40  ;;  %v1345_v54 = vmul.f32 %v1341_v49, %v1285_v34  ;;  %vm1279_vm4 = vcmp.ge.f32.partialorder %v2151_v40, 0.0  ;;  %v1532_v40 = vld [vmem:[#allocation5 + $0x127] ss:$0 sm:$0xff] }
 0x8f6   :  { %1902 = vrcp.f32 %v1294_v39  ;;  %v1292_v43 = vmul.f32 0.3275911, %v1288_v42  ;;  %v1344_v55 = vsub.f32 0.0, %v1288_v42  ;;  %v1351_v58 = vmul.f32 1.442695, %v1346_v51 }
 0x8f7   :  { %1904 = vrcp.f32 %v1293_v41  ;;  %v1291_v46 = vmul.f32 0.3275911, %v1287_v44  ;;  %v1343_v59 = vsub.f32 0.0, %v1287_v44  ;;  %v1349_v63 = vmul.f32 1.442695, %v1345_v54 }
 0x8f8   :  { %v1296_v45 = vadd.f32 1.0, %v1292_v43  ;;  %v1348_v3 = vmul.f32 %v1344_v55, %v1288_v42  ;;  %v1994_v51 = vmov -1.0  }
 0x8f9   :  { %v1295_v48 = vadd.f32 1.0, %v1291_v46  ;;  %v1347_v9 = vmul.f32 %v1343_v59, %v1287_v44  ;;  %v1283_v38 = vsel %vm1279_vm4, 1.0, %v1994_v51 }
 0x8fa   :  { %1906 = vrcp.f32 %v1296_v45  ;;  %v1355_v14 = vmul.f32 1.442695, %v1348_v3 }
 0x8fb   :  { %1908 = vrcp.f32 %v1295_v48  ;;  %v1353_v0 = vmul.f32 1.442695, %v1347_v9 }
 0x8fc   :  { %1910 = vpow2.f32 %v1351_v58 }
 0x8fd   :  { %1912 = vpow2.f32 %v1349_v63 }
 0x8fe   :  { %1914 = vpow2.f32 %v1355_v14  ;;  %v1271_v14 = vmul.f32 0.5, %v2145_v35 }
 0x8ff   :  { %1916 = vpow2.f32 %v1353_v0 }
 0x900   :  { %v1903_v50 = vpop.eup %1902 }
 0x901   :  { %v1905_v52 = vpop.eup %1904  ;;  %v1306_v53 = vmul.f32 1.0614054, %v1903_v50 }
 0x902   :  { %v1305_v56 = vmul.f32 1.0614054, %v1905_v52 }
 0x903   :  { %v1310_v57 = vadd.f32 -1.4531521, %v1306_v53  ;;  %v1282_v53 = vsel %vm1278_vm1, 1.0, %v1994_v51 }
 0x904   :  { %v1309_v60 = vadd.f32 -1.4531521, %v1305_v56  ;;  %v1907_v61 = vpop.eup %1906 }
 0x905   :  { %v1314_v62 = vmul.f32 %v1903_v50, %v1310_v57  ;;  %v1308_v6 = vmul.f32 1.0614054, %v1907_v61  ;;  %v1909_v8 = vpop.eup %1908  ;;  %v1281_v57 = vsel %vm1277_vm2, 1.0, %v1994_v51 }
 0x906   :  { %v1313_v4 = vmul.f32 %v1905_v52, %v1309_v60  ;;  %v1307_v16 = vmul.f32 1.0614054, %v1909_v8  ;;  %v1911_v39 = vpop.eup %1910 }
 0x907   :  { %v1318_v7 = vadd.f32 1.4214138, %v1314_v62  ;;  %v1312_v11 = vadd.f32 -1.4531521, %v1308_v6  ;;  %v1913_v43 = vpop.eup %1912  ;;  %v1284_v6 = vsel %vm1280_vm3, 1.0, %v1994_v51 }
 0x908   :  { %v1317_v10 = vadd.f32 1.4214138, %v1313_v4  ;;  %v1311_v20 = vadd.f32 -1.4531521, %v1307_v16  ;;  %v1270_v4 = vmul.f32 0.5, %v2131_v27  ;;  %v1272_v16 = vmul.f32 0.5, %v2142_v32 }
 0x909   :  { %v1322_v12 = vmul.f32 %v1903_v50, %v1318_v7  ;;  %v1316_v18 = vmul.f32 %v1907_v61, %v1312_v11 }
 0x90a   :  { %v1321_v17 = vmul.f32 %v1905_v52, %v1317_v10  ;;  %v1315_v25 = vmul.f32 %v1909_v8, %v1311_v20 }
 0x90b   :  { %v1326_v19 = vadd.f32 -0.28449672, %v1322_v12  ;;  %v1320_v23 = vadd.f32 1.4214138, %v1316_v18 }
 0x90c   :  { %v1325_v22 = vadd.f32 -0.28449672, %v1321_v17  ;;  %v1319_v31 = vadd.f32 1.4214138, %v1315_v25 }
 0x90d   :  { %v1330_v24 = vmul.f32 %v1903_v50, %v1326_v19  ;;  %v1324_v5 = vmul.f32 %v1907_v61, %v1320_v23 }
 0x90e   :  { %v1329_v26 = vmul.f32 %v1905_v52, %v1325_v22  ;;  %v1323_v37 = vmul.f32 %v1909_v8, %v1319_v31 }
 0x90f   :  { %v1334_v30 = vadd.f32 0.2548296, %v1330_v24  ;;  %v1328_v34 = vadd.f32 -0.28449672, %v1324_v5 }
 0x910   :  { %v1333_v33 = vadd.f32 0.2548296, %v1329_v26  ;;  %v1327_v45 = vadd.f32 -0.28449672, %v1323_v37 }
 0x911   :  { %v1338_v36 = vmul.f32 %v1903_v50, %v1334_v30  ;;  %v1332_v42 = vmul.f32 %v1907_v61, %v1328_v34  ;;  %v1915_v50 = vpop.eup %1914 }
 0x912   :  { %v1337_v41 = vmul.f32 %v1905_v52, %v1333_v33  ;;  %v1331_v49 = vmul.f32 %v1909_v8, %v1327_v45  ;;  %v1917_v62 = vpop.eup %1916 }
 0x913   :  { %v1358_v44 = vmul.f32 %v1911_v39, %v1338_v36  ;;  %v1336_v47 = vadd.f32 0.2548296, %v1332_v42 }
 0x914   :  { %v1357_v46 = vmul.f32 %v1913_v43, %v1337_v41  ;;  %v1335_v52 = vadd.f32 0.2548296, %v1331_v49 }
 0x915   :  { %v1362_v48 = vsub.f32 1.0, %v1358_v44  ;;  %v1340_v55 = vmul.f32 %v1907_v61, %v1336_v47 }
 0x916   :  { %v1361_v54 = vsub.f32 1.0, %v1357_v46  ;;  %v1339_v60 = vmul.f32 %v1909_v8, %v1335_v52 }
 0x917   :  { %v1366_v56 = vmul.f32 %v1362_v48, %v1282_v53  ;;  %v1360_v29 = vmul.f32 %v1915_v50, %v1340_v55 }
 0x918   :  { %v1365_v58 = vmul.f32 %v1361_v54, %v1281_v57  ;;  %v1359_v61 = vmul.f32 %v1917_v62, %v1339_v60 }
 0x919   :  { %v1370_v59 = vadd.f32 1.0, %v1366_v56  ;;  %v1364_v3 = vsub.f32 1.0, %v1360_v29 }
 0x91a   :  { %v1369_v63 = vadd.f32 1.0, %v1365_v58  ;;  %v1363_v11 = vsub.f32 1.0, %v1359_v61 }
 0x91b   :  { %v1368_v9 = vmul.f32 %v1364_v3, %v1284_v6  ;;  %v1374_v10 = vmul.f32 %v1370_v59, %v1270_v4 }
 0x91c   :  { %v1373_v7 = vmul.f32 %v1369_v63, %v1269_v1  ;;  %v1367_v12 = vmul.f32 %v1363_v11, %v1283_v38 }
 0x91d   :  { %v1372_v8 = vadd.f32 1.0, %v1368_v9 }
 0x91e   :  { %1769 = vmatprep.mubr.f32.mxu0 %v1373_v7  ;;  %v1371_v28 = vadd.f32 1.0, %v1367_v12 }
 0x91f   :  { %1770 = vmatmul.mubr.f32.vlgmr.msra.gmra.mrb[16].mxu0 %v1374_v10  ;;  %v1376_v27 = vmul.f32 %v1372_v8, %v1272_v16 }
 0x920   :  { %v1375_v17 = vmul.f32 %v1371_v28, %v1271_v14 }
 0x922   :  { %1772 = vmatprep.mubr.f32.mxu0 %v1375_v17 }
 0x923   :  { %1773 = vmatmul.mubr.f32.gmra.mrb[18].mxu0 %v1376_v27 }
 0x9f2   :  { %v1771_v18 = vpop.f32.mrb[16].mxu0 }
 0x9f3   :  { %v1453_v19 = vadd.f32 %v1771_v18, %v1532_v40  ;;  %v1447_v20 = vpop.f32.mrb[17].mxu0 }
 0x9f4   :  { %v1448_v0 = vadd.f32 %v1532_v40, %v1447_v20 }
 0x9f5   :  { %v1467_v22 = vadd.f32 %v1453_v19, %v2100_v13 }
 0x9f6   :  { %v1466_v23 = vadd.f32 %v1448_v0, %v2103_v15  ;;  %v1774_v35 = vpop.f32.mrb[18].mxu0 }
 0x9f7   :  { %1471 = vst.msk [vmem:[#allocation7 + $0x8] sm:$0xff] %vm89_vm0, %v1467_v22  ;;  %v1463_v24 = vadd.f32 %v1774_v35, %v1532_v40  ;;  %v1457_v32 = vpop.f32.mrb[19].mxu0 }
 0x9f8   :  { %1470 = vst.msk [vmem:[#allocation7] sm:$0xff] %vm89_vm0, %v1466_v23  ;;  %v1458_v25 = vadd.f32 %v1532_v40, %v1457_v32 }
 0x9f9   :  { %v1469_v26 = vadd.f32 %v1463_v24, %v2110_v21 }
 0x9fa   :  { %v1468_v5 = vadd.f32 %v1458_v25, %v2113_v2 }
 0x9fb   :  { %1473 = vst.msk [vmem:[#allocation7 + $0x18] sm:$0xff] %vm89_vm0, %v1469_v26 }
 0x9fc   :  { %1472 = vst.msk [vmem:[#allocation7 + $0x10] sm:$0xff] %vm89_vm0, %v1468_v5 }
 0x9fd   :  { %1973 = shalt.err (!%p1970_p6)
}
 0x9fe   :  { %s1974_s10 = scalar_lea.hbm %s2188_s2, 512 }
 0x9ff   :  { %p1975_p7 = scmp.ne.s32.totalorder %s2188_s2, %s1974_s10  ;;  %p1978_p8 = scmp.lt.u32.totalorder %s1974_s10, %s2188_s2 }
 0xa01   :  { %p1980_p9 = pnand %p1978_p8, %p1975_p7 }
 0xa03   :  { %1983 = shalt.err (!%p1980_p9)
}
 0xa04   :  { %1485 = dma.vmem_to_hbm [thread:$0]  %s1480_s6, 512, %s2188_s2, [#allocation4], %s1991_s19, %s1991_s19, %s1992_s20  }
 0xa05   :  { %1988 = dma.done.wait [#allocation4], 512  }
 0xa06   :  { %1989 = vsyncadd [#allocation4], 4294966784 }
 0xa07   :  { %1489 = vsyncpa [#allocation3], 1 }
 0xa08   :  { %1490 = vsyncpa [#allocation6], 1 }
 0xa09   :  { %1491 = vsyncpa [#allocation4], 1 }

</bundles_post_ra>
